<compile_context>
chip_gen: v5e
topology: v5e:2x2
jax: 0.10.0
libtpu: 0.0.40
codegen_flags: <defaults>
</compile_context>

<pallas_src>
import jax
import jax.numpy as jnp
from jax.experimental import pallas as pl
from jax.experimental.pallas import tpu as pltpu
from jax.scipy.linalg import block_diag


def _round_up(n, m):
    return -(-n // m) * m


def _layout(cfg):
    """Static layout of the packed weight slab (Python ints only)."""
    C, E, L = cfg["capacity_range"], cfg["embedding_size"], cfg["max_levels"]
    H, NH, F = cfg["hidden_width"], cfg["hidden_length"], cfg["num_feats"]
    L1 = L + 1
    cb = F - L1                     # number of continuous features
    OHW = L1 * C                    # flat one-hot width
    EMW = L1 * E                    # flat embedding width (BN width = cb + EMW)
    KZ = _round_up(cb + OHW, 8)     # lane width of the routed input z
    LANES = _round_up(max(H, cb + OHW), 128)
    offs, r = {}, 0
    offs["G"] = r;    r += _round_up(F, 8)       # routing matrix rows
    offs["CLS"] = r;  r += 8                     # per-lane class-id row
    offs["HID"] = r;  r += NH * LANES            # hidden weights, full-K blocks
    offs["WOUT"] = r; r += LANES                 # out_layer (heads folded), full-K
    offs["BIAS"] = r; r += _round_up(NH + 1, 8)  # hidden biases + out bias
    return dict(C=C, E=E, L=L, L1=L1, H=H, NH=NH, F=F, cb=cb, OHW=OHW, EMW=EMW,
                KZ=KZ, LANES=LANES, offs=offs, ROWS=r)


def prepare_params(p, cfg):
    """One-time packing of static weights: a single f32 slab + small fold helpers."""
    m = _layout(cfg)
    C, L1, H, NH, F = m["C"], m["L1"], m["H"], m["NH"], m["F"]
    cb, OHW, KZ, LANES = m["cb"], m["OHW"], m["KZ"], m["LANES"]
    o = m["offs"]
    f32 = jnp.float32

    # Embedding as ONE block-diagonal matrix over the flat one-hot (t_w = block 0).
    w_emb = block_diag(p["t_w"], *([p["k_w"]] * (L1 - 1))).astype(f32)  # [OHW, EMW]
    # BN gamma folded statically into in_layer; beta folded into its bias.
    # Pre-BN embedding biases t_b/k_b cancel exactly under batch-stat BN -> dropped.
    w_in_g = (p["in_w"] * p["gamma"][:, None]).astype(f32)              # [cb+EMW, H]
    b_in_g = (p["in_b"] + p["beta"] @ p["in_w"]).astype(f32)            # [H]
    # Four 16->1 heads folded into out_layer (exact: no nonlinearity in between).
    whead = block_diag(p["z0_w"], p["z1_w"], p["q_w"], p["w_w"])        # [D, 4]
    bhead = jnp.concatenate([p["z0_b"], p["z1_b"], p["q_b"], p["w_b"]])
    w_out = (p["out_w"] @ whead).astype(f32)                            # [H, 4]
    b_out = (p["out_b"] @ whead + bhead).astype(f32)                    # [4]

    # Routing matrix G: continuous feats pass through to lanes [0, cb); categorical
    # column m is replicated across its C one-hot lanes [cb+m*C, cb+(m+1)*C).
    G = jnp.zeros((F, KZ), f32)
    G = G.at[jnp.arange(cb), jnp.arange(cb)].set(1.0)
    for q in range(L1):
        G = G.at[cb + q, cb + q * C: cb + (q + 1) * C].set(1.0)
    # Per-lane class id; one compare against this row builds the whole one-hot.
    # -1 marks pass-through / padding lanes.
    cls = jnp.full((KZ,), -1.0, f32)
    cls = cls.at[cb:cb + OHW].set(jnp.tile(jnp.arange(C, dtype=f32), L1))

    slab = jnp.zeros((m["ROWS"], LANES), f32)
    slab = slab.at[o["G"]:o["G"] + F, :KZ].set(G)
    slab = slab.at[o["CLS"], :KZ].set(cls)
    for i in range(NH):
        slab = slab.at[o["HID"] + i * LANES:o["HID"] + i * LANES + H, :H].set(p["h_w"][i])
        slab = slab.at[o["BIAS"] + i, :H].set(p["h_b"][i])
    slab = slab.at[o["WOUT"]:o["WOUT"] + H, :4].set(w_out)
    slab = slab.at[o["BIAS"] + NH, :4].set(b_out)

    return dict(slab=slab, w_emb=w_emb, w_in_g=w_in_g, b_in_g=b_in_g)


def make_kap_lcm_forward(cfg):
    m = _layout(cfg)
    L1, H, NH, F = m["L1"], m["H"], m["NH"], m["F"]
    cb, OHW, KZ, LANES, ROWS = m["cb"], m["OHW"], m["KZ"], m["LANES"], m["ROWS"]
    o = m["offs"]
    f32 = jnp.float32

    def _routed_input(x, w_ref):
        """z = [feats | one_hot(caps) | 0] in [TB, KZ]: one dot + one compare + one select."""
        G = w_ref[o["G"]:o["G"] + F, :KZ]
        cls = w_ref[o["CLS"]:o["CLS"] + 1, :KZ]
        y = jnp.dot(x, G, preferred_element_type=f32)   # feats routed, caps replicated
        return jnp.where(cls >= 0.0, (y == cls).astype(f32), y)

    def stats_kernel(x_ref, w_ref, s_ref):
        # Resident accumulator across the "arbitrary" batch-tile axis.
        @pl.when(pl.program_id(0) == 0)
        def _init():
            s_ref[...] = jnp.zeros_like(s_ref)
        z = _routed_input(x_ref[...], w_ref)
        s_ref[0:1, :KZ] = s_ref[0:1, :KZ] + jnp.sum(z, axis=0, keepdims=True)
        s_ref[1:2, :KZ] = s_ref[1:2, :KZ] + jnp.sum(z * z, axis=0, keepdims=True)

    def main_kernel(x_ref, dyn_ref, w_ref, out_ref):
        z = _routed_input(x_ref[...], w_ref)
        # Fused (embedding + BatchNorm + in_layer) matmul: batch stats and the
        # block-diagonal embedding are pre-folded into `dyn` by the wrapper.
        h = jnp.dot(z, dyn_ref[0:KZ, :], preferred_element_type=f32)
        h = jnp.maximum(h + dyn_ref[KZ:KZ + 1, :], 0.0)  # ReLU; Dropout(p=0) == id
        for i in range(NH):                              # hidden [Linear -> ReLU] * NH
            hw = w_ref[o["HID"] + i * LANES:o["HID"] + (i + 1) * LANES, :]
            hb = w_ref[o["BIAS"] + i:o["BIAS"] + i + 1, :]
            h = jnp.maximum(jnp.dot(h, hw, preferred_element_type=f32) + hb, 0.0)
        wo = w_ref[o["WOUT"]:o["WOUT"] + LANES, :]       # out_layer with heads folded
        bo = w_ref[o["BIAS"] + NH:o["BIAS"] + NH + 1, :]
        res = jnp.dot(h, wo, preferred_element_type=f32) + bo
        out_ref[...] = res[:, :4]

    def _cparams(sem):
        return pltpu.CompilerParams(dimension_semantics=(sem,),
                                    vmem_limit_bytes=32 * 1024 * 1024)

    @jax.jit
    def forward(x, packed):
        slab = packed["slab"]
        B = x.shape[0]
        # Tile choice: >=512 rows amortizes per-step overhead and feeds the MXU
        # on v5e (4x128) / v6e / v7x (256-wide); small batches use one tile.
        TB = 512 if B >= 512 else _round_up(max(B, 1), 8)
        Bp = _round_up(B, TB)
        xp = x.astype(f32)
        if Bp != B:  # pad rows: feats=0, caps=-1 -> contribute nothing to batch stats
            pad = jnp.concatenate([jnp.zeros((Bp - B, cb), f32),
                                   jnp.full((Bp - B, L1), -1.0, f32)], axis=1)
            xp = jnp.concatenate([xp, pad], axis=0)
        nb = Bp // TB

        # Pass 1: per-column sums / sums-of-squares of [feats | one-hot].
        stats = pl.pallas_call(
            stats_kernel,
            out_shape=jax.ShapeDtypeStruct((8, LANES), f32),
            grid=(nb,),
            in_specs=[pl.BlockSpec((TB, F), lambda i: (i, 0)),
                      pl.BlockSpec((ROWS, LANES), lambda i: (0, 0))],
            out_specs=pl.BlockSpec((8, LANES), lambda i: (0, 0)),
            compiler_params=_cparams("arbitrary"),
        )(xp, slab)

        # Analytic BatchNorm stats + run-time weight folding (tiny XLA ops).
        # One-hot inputs make E[emb] and E[emb^2] exact linear functions of the
        # per-class frequencies, so the embedding is never materialised.
        with jax.default_matmul_precision("float32"):
            n = jnp.asarray(B, f32)
            sum_z, sum_z2 = stats[0, :KZ], stats[1, :KZ]
            mean_f, ex2_f = sum_z[:cb] / n, sum_z2[:cb] / n
            p_oh = sum_z[cb:cb + OHW] / n                       # class frequencies
            w_emb = packed["w_emb"]
            mu = jnp.concatenate([mean_f, p_oh @ w_emb])
            ex2 = jnp.concatenate([ex2_f, p_oh @ (w_emb * w_emb)])
            # TODO(synk): E[x^2]-mu^2 for the continuous features can lose precision
            # on ill-conditioned data; a centred second pass would be safer there.
            var = jnp.maximum(ex2 - mu * mu, 0.0)
            rs = jax.lax.rsqrt(var + 1e-5)
            w_eff = packed["w_in_g"] * rs[:, None]               # BN folded into in_layer
            b_eff = packed["b_in_g"] - (mu * rs) @ packed["w_in_g"]
            dyn = jnp.zeros((KZ + 8, LANES), f32)
            dyn = dyn.at[:cb, :H].set(w_eff[:cb])
            dyn = dyn.at[cb:cb + OHW, :H].set(w_emb @ w_eff[cb:])  # embedding folded in
            dyn = dyn.at[KZ, :H].set(b_eff)

        # Pass 2: fused front-end dot + MLP per batch tile (parallel across cores).
        out = pl.pallas_call(
            main_kernel,
            out_shape=jax.ShapeDtypeStruct((Bp, 4), f32),
            grid=(nb,),
            in_specs=[pl.BlockSpec((TB, F), lambda i: (i, 0)),
                      pl.BlockSpec((KZ + 8, LANES), lambda i: (0, 0)),
                      pl.BlockSpec((ROWS, LANES), lambda i: (0, 0))],
            out_specs=pl.BlockSpec((TB, 4), lambda i: (i, 0)),
            compiler_params=_cparams("parallel"),
        )(xp, dyn, slab)
        return out[:B]

    return forward


# ----------------------------- init + reference -----------------------------
# Weights are stored already transposed to the x @ W convention.

def _kaiming(key, fan_in, fan_out):
    return jax.random.normal(key, (fan_in, fan_out), jnp.float32) * jnp.sqrt(2.0 / fan_in)


def _bias(key, fan_in, n):
    bound = 1.0 / float(fan_in) ** 0.5
    return jax.random.uniform(key, (n,), jnp.float32, minval=-bound, maxval=bound)


def init_params(key, cfg):
    C, E, L = cfg["capacity_range"], cfg["embedding_size"], cfg["max_levels"]
    H, D, NH = cfg["hidden_width"], cfg["decision_dim"], cfg["hidden_length"]
    cb = cfg["num_feats"] - (L + 1)
    width = cb + (L + 1) * E
    Hd = D // 4
    ks = list(jax.random.split(key, 16 + 2 * NH))
    nxt = iter(ks)
    p = {}
    p["t_w"] = _kaiming(next(nxt), C, E); p["t_b"] = _bias(next(nxt), C, E)
    p["k_w"] = _kaiming(next(nxt), C, E); p["k_b"] = _bias(next(nxt), C, E)
    p["gamma"] = jnp.ones((width,), jnp.float32)
    p["beta"] = jnp.zeros((width,), jnp.float32)
    p["in_w"] = _kaiming(next(nxt), width, H); p["in_b"] = _bias(next(nxt), width, H)
    p["h_w"] = jnp.stack([_kaiming(next(nxt), H, H) for _ in range(NH)])
    p["h_b"] = jnp.stack([_bias(next(nxt), H, H) for _ in range(NH)])
    p["out_w"] = _kaiming(next(nxt), H, D); p["out_b"] = _bias(next(nxt), H, D)
    p["z0_w"] = _kaiming(next(nxt), Hd, 1); p["z0_b"] = _bias(next(nxt), Hd, 1)
    p["z1_w"] = _kaiming(next(nxt), Hd, 1); p["z1_b"] = _bias(next(nxt), Hd, 1)
    p["q_w"] = _kaiming(next(nxt), Hd, 1);  p["q_b"] = _bias(next(nxt), Hd, 1)
    p["w_w"] = _kaiming(next(nxt), Hd, 1);  p["w_b"] = _bias(next(nxt), Hd, 1)
    return p


def kap_lcm_reference(x, p, cfg):
    """Pure-JAX reference mirroring the PyTorch forward (training-mode BN)."""
    C, E, L = cfg["capacity_range"], cfg["embedding_size"], cfg["max_levels"]
    Hd = cfg["decision_dim"] // 4
    cb = cfg["num_feats"] - (L + 1)
    B = x.shape[0]
    feats = x[:, :cb].astype(jnp.float32)
    caps = x[:, cb:].astype(jnp.int32)
    oh = jax.nn.one_hot(caps, C, dtype=jnp.float32)
    t_emb = oh[:, 0, :] @ p["t_w"] + p["t_b"]
    k_emb = (oh[:, 1:, :] @ p["k_w"] + p["k_b"]).reshape(B, L * E)
    inp = jnp.concatenate([feats, t_emb, k_emb], axis=-1)
    mu = inp.mean(axis=0)
    var = ((inp - mu) ** 2).mean(axis=0)
    norm = (inp - mu) / jnp.sqrt(var + 1e-5) * p["gamma"] + p["beta"]
    h = jax.nn.relu(norm @ p["in_w"] + p["in_b"])
    for i in range(cfg["hidden_length"]):
        h = jax.nn.relu(h @ p["h_w"][i] + p["h_b"][i])
    o = h @ p["out_w"] + p["out_b"]
    z0 = o[:, 0:Hd] @ p["z0_w"] + p["z0_b"]
    z1 = o[:, Hd:2 * Hd] @ p["z1_w"] + p["z1_b"]
    q = o[:, 2 * Hd:3 * Hd] @ p["q_w"] + p["q_b"]
    w = o[:, 3 * Hd:4 * Hd] @ p["w_w"] + p["w_b"]
    return jnp.concatenate([z0, z1, q, w], axis=-1)


if __name__ == "__main__":
    cfg = dict(
        num_feats=9,          # 4 continuous feats + (max_levels + 1) categorical cols
        capacity_range=8,
        embedding_size=8,
        hidden_length=1,
        hidden_width=32,
        max_levels=4,
        decision_dim=64,
    )
    key = jax.random.PRNGKey(0)
    pkey, k1, k2, k3, k4 = jax.random.split(key, 5)
    params = init_params(pkey, cfg)
    packed = prepare_params(params, cfg)      # one-time static weight packing
    forward = make_kap_lcm_forward(cfg)

    cb = cfg["num_feats"] - (cfg["max_levels"] + 1)

    def make_x(kf, kc, B):
        feats = jax.random.normal(kf, (B, cb), jnp.float32)
        caps = jax.random.randint(kc, (B, cfg["max_levels"] + 1), 0,
                                  cfg["capacity_range"])
        return jnp.concatenate([feats, caps.astype(jnp.float32)], axis=1)

    # Small single-tile case and a multi-tile case (exercises batch grid + padding).
    for (kf, kc, B) in ((k1, k2, 8), (k3, k4, 1000)):
        x = make_x(kf, kc, B)
        out = jax.block_until_ready(forward(x, packed))
        with jax.default_matmul_precision("float32"):
            ref = kap_lcm_reference(x, params, cfg)
        assert out.shape == (B, 4), out.shape
        # Tolerance sized to cover the TPU default (bf16-pass) matmul precision.
        assert jnp.allclose(out, ref, atol=3e-2, rtol=3e-2), (
            float(jnp.max(jnp.abs(out - ref))))
    print("KERNEL_OK")
</pallas_src>

<mosaic_0001>
module attributes {stable_mosaic.version = 11 : i64} {
  func.func @stats_kernel(%arg0: i32, %arg1: memref<8x9xf32, #tpu.memory_space<vmem>>, %arg2: memref<288x128xf32, #tpu.memory_space<vmem>>, %arg3: memref<8x128xf32, #tpu.memory_space<vmem>>) attributes {dimension_semantics = [#tpu.dimension_semantics<arbitrary>], iteration_bounds = array<i64: 1>, scalar_prefetch = 0 : i64, scratch_operands = 0 : i64, tpu.core_type = #tpu.core_type<tc>, window_params = [{transform_indices = @transform_0, window_bounds = array<i64: 8, 9>}, {pipeline_mode = #tpu.pipeline_mode<synchronous>, transform_indices = @transform_1, window_bounds = array<i64: 288, 128>}, {pipeline_mode = #tpu.pipeline_mode<synchronous>, transform_indices = @transform_2, window_bounds = array<i64: 8, 128>}]} {
    %c0_i32 = arith.constant 0 : i32
    %0 = arith.cmpi eq, %arg0, %c0_i32 : i32
    %1 = arith.extui %0 : i1 to i32
    %c0_i32_0 = arith.constant 0 : i32
    %2 = arith.cmpi ne, %1, %c0_i32_0 : i32
    scf.if %2 {
      %cst_15 = arith.constant 0.000000e+00 : f32
      %27 = vector.broadcast %cst_15 : f32 to vector<8x128xf32>
      %c0_16 = arith.constant 0 : index
      %c0_17 = arith.constant 0 : index
      %28 = vector.load %arg3[%c0_16, %c0_17] : memref<8x128xf32, #tpu.memory_space<vmem>>, vector<8x128xf32>
      tpu.vector_store %arg3[%c0_16, %c0_17], %27 {strides = array<i32>} : memref<8x128xf32, #tpu.memory_space<vmem>>, vector<8x128xf32>,
    } else {
    }
    %c0 = arith.constant 0 : index
    %c0_1 = arith.constant 0 : index
    %3 = vector.load %arg1[%c0, %c0_1] : memref<8x9xf32, #tpu.memory_space<vmem>>, vector<8x9xf32>
    %c0_2 = arith.constant 0 : index
    %c0_3 = arith.constant 0 : index
    %4 = vector.load %arg2[%c0_2, %c0_3] : memref<288x128xf32, #tpu.memory_space<vmem>>, vector<9x48xf32>
    %c16 = arith.constant 16 : index
    %c0_4 = arith.constant 0 : index
    %5 = vector.load %arg2[%c16, %c0_4] : memref<288x128xf32, #tpu.memory_space<vmem>>, vector<1x48xf32>
    %cst = arith.constant dense<0.000000e+00> : vector<8x48xf32>
    %6 = tpu.matmul %3, %4, %cst {dimension_numbers = #tpu.dot_dimension_numbers<[1], [0], [0], [1], [0, 0, 1, 1], [], []>} : vector<8x9xf32>, vector<9x48xf32>, vector<8x48xf32> -> vector<8x48xf32>
    %cst_5 = arith.constant 0.000000e+00 : f32
    %7 = vector.broadcast %cst_5 : f32 to vector<1x48xf32>
    %8 = arith.cmpf oge, %5, %7 : vector<1x48xf32>
    %9 = vector.broadcast %5 : vector<1x48xf32> to vector<8x48xf32>
    %10 = arith.cmpf oeq, %6, %9 : vector<8x48xf32>
    %11 = arith.extui %10 : vector<8x48xi1> to vector<8x48xi32>
    %12 = arith.sitofp %11 : vector<8x48xi32> to vector<8x48xf32>
    %13 = vector.shape_cast %8 : vector<1x48xi1> to vector<1x48xi1>
    %14 = vector.broadcast %13 : vector<1x48xi1> to vector<8x48xi1>
    %15 = arith.select %14, %12, %6 : vector<8x48xi1>, vector<8x48xf32>
    %c0_6 = arith.constant 0 : index
    %c0_7 = arith.constant 0 : index
    %16 = vector.load %arg3[%c0_6, %c0_7] : memref<8x128xf32, #tpu.memory_space<vmem>>, vector<1x48xf32>
    %cst_8 = arith.constant dense<0.000000e+00> : vector<48xf32>
    %17 = vector.multi_reduction <add>, %15, %cst_8 [0] : vector<8x48xf32> to vector<48xf32>
    %18 = vector.shape_cast %17 : vector<48xf32> to vector<1x48xf32>
    %19 = arith.addf %16, %18 : vector<1x48xf32>
    %c0_9 = arith.constant 0 : index
    %c0_10 = arith.constant 0 : index
    %20 = vector.load %arg3[%c0_9, %c0_10] : memref<8x128xf32, #tpu.memory_space<vmem>>, vector<1x48xf32>
    tpu.vector_store %arg3[%c0_9, %c0_10], %19 {strides = array<i32>} : memref<8x128xf32, #tpu.memory_space<vmem>>, vector<1x48xf32>,
    %c1 = arith.constant 1 : index
    %c0_11 = arith.constant 0 : index
    %21 = vector.load %arg3[%c1, %c0_11] : memref<8x128xf32, #tpu.memory_space<vmem>>, vector<1x48xf32>
    %22 = arith.mulf %15, %15 : vector<8x48xf32>
    %cst_12 = arith.constant dense<0.000000e+00> : vector<48xf32>
    %23 = vector.multi_reduction <add>, %22, %cst_12 [0] : vector<8x48xf32> to vector<48xf32>
    %24 = vector.shape_cast %23 : vector<48xf32> to vector<1x48xf32>
    %25 = arith.addf %21, %24 : vector<1x48xf32>
    %c1_13 = arith.constant 1 : index
    %c0_14 = arith.constant 0 : index
    %26 = vector.load %arg3[%c1_13, %c0_14] : memref<8x128xf32, #tpu.memory_space<vmem>>, vector<1x48xf32>
    tpu.vector_store %arg3[%c1_13, %c0_14], %25 {strides = array<i32>} : memref<8x128xf32, #tpu.memory_space<vmem>>, vector<1x48xf32>,
    return
  }
  func.func @transform_0(%arg0: i32) -> (i32, i32) {
    %c0_i32 = arith.constant 0 : i32
    %c0_i32_0 = arith.constant 0 : i32
    return %arg0, %c0_i32 : i32, i32
  }
  func.func @transform_1(%arg0: i32) -> (i32, i32) {
    %c0_i32 = arith.constant 0 : i32
    %c0_i32_0 = arith.constant 0 : i32
    %c0_i32_1 = arith.constant 0 : i32
    return %c0_i32, %c0_i32_0 : i32, i32
  }
  func.func @transform_2(%arg0: i32) -> (i32, i32) {
    %c0_i32 = arith.constant 0 : i32
    %c0_i32_0 = arith.constant 0 : i32
    %c0_i32_1 = arith.constant 0 : i32
    return %c0_i32, %c0_i32_0 : i32, i32
  }
}

module attributes {stable_mosaic.version = 11 : i64} {
  func.func @main_kernel(%arg0: i32, %arg1: memref<8x9xf32, #tpu.memory_space<vmem>>, %arg2: memref<56x128xf32, #tpu.memory_space<vmem>>, %arg3: memref<288x128xf32, #tpu.memory_space<vmem>>, %arg4: memref<8x4xf32, #tpu.memory_space<vmem>>) attributes {dimension_semantics = [#tpu.dimension_semantics<parallel>], iteration_bounds = array<i64: 1>, scalar_prefetch = 0 : i64, scratch_operands = 0 : i64, tpu.core_type = #tpu.core_type<tc>, window_params = [{transform_indices = @transform_0, window_bounds = array<i64: 8, 9>}, {pipeline_mode = #tpu.pipeline_mode<synchronous>, transform_indices = @transform_1, window_bounds = array<i64: 56, 128>}, {pipeline_mode = #tpu.pipeline_mode<synchronous>, transform_indices = @transform_2, window_bounds = array<i64: 288, 128>}, {transform_indices = @transform_3, window_bounds = array<i64: 8, 4>}]} {
    %c0 = arith.constant 0 : index
    %c0_0 = arith.constant 0 : index
    %0 = vector.load %arg1[%c0, %c0_0] : memref<8x9xf32, #tpu.memory_space<vmem>>, vector<8x9xf32>
    %c0_1 = arith.constant 0 : index
    %c0_2 = arith.constant 0 : index
    %1 = vector.load %arg3[%c0_1, %c0_2] : memref<288x128xf32, #tpu.memory_space<vmem>>, vector<9x48xf32>
    %c16 = arith.constant 16 : index
    %c0_3 = arith.constant 0 : index
    %2 = vector.load %arg3[%c16, %c0_3] : memref<288x128xf32, #tpu.memory_space<vmem>>, vector<1x48xf32>
    %cst = arith.constant dense<0.000000e+00> : vector<8x48xf32>
    %3 = tpu.matmul %0, %1, %cst {dimension_numbers = #tpu.dot_dimension_numbers<[1], [0], [0], [1], [0, 0, 1, 1], [], []>} : vector<8x9xf32>, vector<9x48xf32>, vector<8x48xf32> -> vector<8x48xf32>
    %cst_4 = arith.constant 0.000000e+00 : f32
    %4 = vector.broadcast %cst_4 : f32 to vector<1x48xf32>
    %5 = arith.cmpf oge, %2, %4 : vector<1x48xf32>
    %6 = vector.broadcast %2 : vector<1x48xf32> to vector<8x48xf32>
    %7 = arith.cmpf oeq, %3, %6 : vector<8x48xf32>
    %8 = arith.extui %7 : vector<8x48xi1> to vector<8x48xi32>
    %9 = arith.sitofp %8 : vector<8x48xi32> to vector<8x48xf32>
    %10 = vector.shape_cast %5 : vector<1x48xi1> to vector<1x48xi1>
    %11 = vector.broadcast %10 : vector<1x48xi1> to vector<8x48xi1>
    %12 = arith.select %11, %9, %3 : vector<8x48xi1>, vector<8x48xf32>
    %c0_5 = arith.constant 0 : index
    %c0_6 = arith.constant 0 : index
    %13 = vector.load %arg2[%c0_5, %c0_6] : memref<56x128xf32, #tpu.memory_space<vmem>>, vector<48x128xf32>
    %cst_7 = arith.constant dense<0.000000e+00> : vector<8x128xf32>
    %14 = tpu.matmul %12, %13, %cst_7 {dimension_numbers = #tpu.dot_dimension_numbers<[1], [0], [0], [1], [0, 0, 1, 1], [], []>} : vector<8x48xf32>, vector<48x128xf32>, vector<8x128xf32> -> vector<8x128xf32>
    %c48 = arith.constant 48 : index
    %c0_8 = arith.constant 0 : index
    %15 = vector.load %arg2[%c48, %c0_8] : memref<56x128xf32, #tpu.memory_space<vmem>>, vector<1x128xf32>
    %16 = vector.broadcast %15 : vector<1x128xf32> to vector<8x128xf32>
    %17 = arith.addf %14, %16 : vector<8x128xf32>
    %cst_9 = arith.constant 0.000000e+00 : f32
    %18 = vector.broadcast %cst_9 : f32 to vector<8x128xf32>
    %19 = arith.maximumf %17, %18 : vector<8x128xf32>
    %c24 = arith.constant 24 : index
    %c0_10 = arith.constant 0 : index
    %20 = vector.load %arg3[%c24, %c0_10] : memref<288x128xf32, #tpu.memory_space<vmem>>, vector<128x128xf32>
    %c280 = arith.constant 280 : index
    %c0_11 = arith.constant 0 : index
    %21 = vector.load %arg3[%c280, %c0_11] : memref<288x128xf32, #tpu.memory_space<vmem>>, vector<1x128xf32>
    %cst_12 = arith.constant dense<0.000000e+00> : vector<8x128xf32>
    %22 = tpu.matmul %19, %20, %cst_12 {dimension_numbers = #tpu.dot_dimension_numbers<[1], [0], [0], [1], [0, 0, 1, 1], [], []>} : vector<8x128xf32>, vector<128x128xf32>, vector<8x128xf32> -> vector<8x128xf32>
    %23 = vector.broadcast %21 : vector<1x128xf32> to vector<8x128xf32>
    %24 = arith.addf %22, %23 : vector<8x128xf32>
    %cst_13 = arith.constant 0.000000e+00 : f32
    %25 = vector.broadcast %cst_13 : f32 to vector<8x128xf32>
    %26 = arith.maximumf %24, %25 : vector<8x128xf32>
    %c152 = arith.constant 152 : index
    %c0_14 = arith.constant 0 : index
    %27 = vector.load %arg3[%c152, %c0_14] : memref<288x128xf32, #tpu.memory_space<vmem>>, vector<128x128xf32>
    %c281 = arith.constant 281 : index
    %c0_15 = arith.constant 0 : index
    %28 = vector.load %arg3[%c281, %c0_15] : memref<288x128xf32, #tpu.memory_space<vmem>>, vector<1x128xf32>
    %cst_16 = arith.constant dense<0.000000e+00> : vector<8x128xf32>
    %29 = tpu.matmul %26, %27, %cst_16 {dimension_numbers = #tpu.dot_dimension_numbers<[1], [0], [0], [1], [0, 0, 1, 1], [], []>} : vector<8x128xf32>, vector<128x128xf32>, vector<8x128xf32> -> vector<8x128xf32>
    %30 = vector.broadcast %28 : vector<1x128xf32> to vector<8x128xf32>
    %31 = arith.addf %29, %30 : vector<8x128xf32>
    %32 = vector.extract_strided_slice %31 {offsets = [0, 0], sizes = [8, 4], strides = [1, 1]} : vector<8x128xf32> to vector<8x4xf32>
    %c0_17 = arith.constant 0 : index
    %c0_18 = arith.constant 0 : index
    %33 = vector.load %arg4[%c0_17, %c0_18] : memref<8x4xf32, #tpu.memory_space<vmem>>, vector<8x4xf32>
    tpu.vector_store %arg4[%c0_17, %c0_18], %32 {strides = array<i32>} : memref<8x4xf32, #tpu.memory_space<vmem>>, vector<8x4xf32>,
    return
  }
  func.func @transform_0(%arg0: i32) -> (i32, i32) {
    %c0_i32 = arith.constant 0 : i32
    %c0_i32_0 = arith.constant 0 : i32
    return %arg0, %c0_i32 : i32, i32
  }
  func.func @transform_1(%arg0: i32) -> (i32, i32) {
    %c0_i32 = arith.constant 0 : i32
    %c0_i32_0 = arith.constant 0 : i32
    %c0_i32_1 = arith.constant 0 : i32
    return %c0_i32, %c0_i32_0 : i32, i32
  }
  func.func @transform_2(%arg0: i32) -> (i32, i32) {
    %c0_i32 = arith.constant 0 : i32
    %c0_i32_0 = arith.constant 0 : i32
    %c0_i32_1 = arith.constant 0 : i32
    return %c0_i32, %c0_i32_0 : i32, i32
  }
  func.func @transform_3(%arg0: i32) -> (i32, i32) {
    %c0_i32 = arith.constant 0 : i32
    %c0_i32_0 = arith.constant 0 : i32
    return %arg0, %c0_i32 : i32, i32
  }
}

</mosaic_0001>

<bundles_post_ra>
// kernel: forward.2
= control target key start
LH: loop header
LB: loop body
LE: loop exit
PB: predicated region body
PF: predicated region fallthrough
CT: control target
= control target key end

     0   :  { %7 = vsyncpa [#allocation3], 0  ;;  %s220_s0 = inlined_call_operand.hbm [shape: f32[8,9], index: 0, kind: input, shape index: {}]   ;;  %s221_s1 = inlined_call_operand.hbm [shape: f32[288,128], index: 1, kind: input, shape index: {}]   ;;  %s222_s2 = inlined_call_operand.vmem [shape: f32[8,128], index: 2, kind: output, shape index: {}]  }
   0x1   :  { %s14_s11 = sshll.u32 %s220_s0, 4  ;;  %s15_s11 = int_to_ptr.hbm [resolvable:$true] %s14_s11 }
   0x2   :  { %8 = vsyncpa [#allocation5], 0  ;;  %s178_s12 = smov [#allocation2]   ;;  %s24_s16 = sshll.u32 %s221_s1, 4  ;;  %s25_s16 = int_to_ptr.hbm [resolvable:$true] %s24_s16 }
   0x3   :  { %s16_s13 = sshll.u32 %s178_s12, 4  ;;  %s179_s17 = smov [#allocation4]   ;;  %s17_s13 = int_to_ptr.vmem [resolvable:$true] %s16_s13 }
   0x4   :  { %19 = dma.hbm_to_vmem [thread:$0]  %s15_s11, 128, %s17_s13, [#allocation3]  }
   0x5   :  { %s26_s18 = sshll.u32 %s179_s17, 4  ;;  %s180_s19 = smov 128   ;;  %s27_s18 = int_to_ptr.vmem [resolvable:$true] %s26_s18 }
   0x6   :  { %s181_s20 = smov 8  }
   0x7   :  { %32 = dma.hbm_to_vmem [thread:$0]  %s25_s16, 4608, %s27_s18, [#allocation5], %s180_s19, %s180_s19, %s181_s20  }
   0x8   :  { %174 = dma.done.wait [#allocation3], 128  }
   0x9   :  { %175 = vsyncadd [#allocation3], 4294967168 }
   0xa   :  { %176 = dma.done.wait [#allocation5], 4608  }
   0xb   :  { %177 = vsyncadd [#allocation5], 4294962688  ;;  %v182_v0 = vmov 0.0   ;;  %vm54_vm0 = vcmask 1040384   ;;  %v48_v1 = vld [vmem:[#allocation4 + $0x8] sm:$0x1] }
   0xc   :  { %45 = vst [vmem:[%s222_s2] sm:$0xff] %v182_v0  ;;  %v47_v2 = vld [vmem:[#allocation4] sm:$0xff]  ;;  %116 = vmatpush.msk.msra.mxu0 %vm54_vm0, %v48_v1  ;;  %v46_v3 = vld [vmem:[#allocation2] sm:$0xff]  ;;  %vm50_vm1 = vcmask 72704   ;;  %v49_v4 = vld [vmem:[#allocation4 + $0x10] sm:$0x1]  ;;  %v183_v5 = vmov 0  }
   0xd   :  { %vm78_vm2 = vcmp.ge.f32.partialorder %v49_v4, 0.0  ;;  %v125_v8 = vld [vmem:[#allocation4 + $0x10] ss:$0 sm:$0xff]  ;;  %vm88_vm5 = vcmask 392192   ;;  %vm97_vm6 = vcmask 385024  }
   0xe   :  { %73 = vmatpush.msra.mxu0 %v47_v2  ;;  %v83_v6 = vsel %vm78_vm2, 1, %v183_v5 }
   0xf   :  { %117 = vmatmul.msk.f32.vlgmr.msra.gmra.mxu0 %vm50_vm1, %v46_v3  ;;  %v84_v7 = vperm.slane %v83_v6, 0 }
  0x11   :  { %vm85_vm3 = vcmp.eq.s32.totalorder %v84_v7, 1 }
  0x13   :  { %v87_v24 = vld [vmem:[%s222_s2] sm:$0x1]  ;;  %v99_v27 = vld [vmem:[%s222_s2 + $0x1] sm:$0x1] }
  0x8c   :  { %v75_v9 = vpop.f32.mrf.mxu0 }
  0x8d   :  { %vm80_vm4 = vcmp.eq.f32.partialorder %v75_v9, %v125_v8 }
  0x8e   :  { %v118_v10 = vsel %vm80_vm4, 1.0, %v182_v0 }
  0x8f   :  { %v86_v11 = vsel %vm85_vm3, %v118_v10, %v75_v9 }
  0x90   :  { %v89_v12 = vsel %vm88_vm5, %v86_v11, 0.0  ;;  %v100_v13 = vmul.f32 %v86_v11, %v86_v11 }
  0x91   :  { %v90_v14 = vrot.slane %v89_v12, 4 }
  0x92   :  { %v101_v15 = vsel %vm88_vm5, %v100_v13, 0.0 }
  0x93   :  { %v91_v16 = vadd.f32 %v90_v14, %v89_v12  ;;  %v102_v17 = vrot.slane %v101_v15, 4 }
  0x95   :  { %v92_v18 = vrot.slane %v91_v16, 2  ;;  %v103_v19 = vadd.f32 %v102_v17, %v101_v15 }
  0x97   :  { %v93_v20 = vadd.f32 %v92_v18, %v91_v16  ;;  %v104_v21 = vrot.slane %v103_v19, 2 }
  0x99   :  { %v94_v22 = vrot.slane %v93_v20, 1  ;;  %v105_v23 = vadd.f32 %v104_v21, %v103_v19 }
  0x9b   :  { %v95_v25 = vadd.f32 %v94_v22, %v93_v20  ;;  %v106_v26 = vrot.slane %v105_v23, 1 }
  0x9d   :  { %v96_v28 = vadd.f32 %v95_v25, %v87_v24  ;;  %v107_v29 = vadd.f32 %v106_v26, %v105_v23 }
  0x9f   :  { %98 = vst.msk [vmem:[%s222_s2] sm:$0x1] %vm97_vm6, %v96_v28  ;;  %v108_v30 = vadd.f32 %v107_v29, %v99_v27 }
  0xa1   :  { %109 = vst.msk [vmem:[%s222_s2 + $0x1] sm:$0x1] %vm97_vm6, %v108_v30 }
  0xa2   :  { %114 = vsyncpa [#allocation3], 1 }
  0xa3   :  { %115 = vsyncpa [#allocation5], 1 }

// kernel: forward.3
= control target key start
LH: loop header
LB: loop body
LE: loop exit
PB: predicated region body
PF: predicated region fallthrough
CT: control target
= control target key end

     0   :  { %vm22_vm0 = vcmask 1040384   ;;  %vm18_vm1 = vcmask 72704   ;;  %v181_v22 = vmov 0   ;;  %vm63_vm5 = vcmask 392192   ;;  %s344_s2 = inlined_call_operand.vmem [shape: f32[288,128], index: 2, kind: input, shape index: {}]   ;;  %s345_s0 = inlined_call_operand.vmem [shape: f32[8,9], index: 0, kind: input, shape index: {}]   ;;  %s346_s1 = inlined_call_operand.vmem [shape: f32[56,128], index: 1, kind: input, shape index: {}]   ;;  %s347_s3 = inlined_call_operand.vmem [shape: f32[8,4], index: 3, kind: output, shape index: {}]  }
   0x1   :  { %v16_v0 = vld [vmem:[%s344_s2 + $0x8] sm:$0x1]  ;;  %v15_v1 = vld [vmem:[%s344_s2] sm:$0xff]  ;;  %v58_v5 = vld [vmem:[%s346_s1 + $0x18] sm:$0xff]  ;;  %v182_v28 = vmov 0.0   ;;  %vm165_vm6 = vcmask 31744  }
   0x2   :  { %171 = vmatpush.msk.msra.mxu0 %vm22_vm0, %v16_v0  ;;  %v14_v2 = vld [vmem:[%s345_s0] sm:$0xff]  ;;  %v60_v3 = vld [vmem:[%s346_s1 + $0x28] sm:$0xff]  ;;  %v57_v6 = vld [vmem:[%s346_s1 + $0x10] sm:$0xff] }
   0x3   :  { %v59_v4 = vld [vmem:[%s346_s1 + $0x20] sm:$0xff]  ;;  %77 = vmatpush.msra.mxu1 %v60_v3  ;;  %v56_v7 = vld [vmem:[%s346_s1 + $0x8] sm:$0xff]  ;;  %v103_v9 = vld [vmem:[%s344_s2 + $0x90] sm:$0xff] }
   0x4   :  { %41 = vmatpush.msra.mxu0 %v15_v1  ;;  %v55_v8 = vld [vmem:[%s346_s1] sm:$0xff]  ;;  %v102_v10 = vld [vmem:[%s344_s2 + $0x88] sm:$0xff]  ;;  %106 = vmatpush.msra.mxu2 %v103_v9  ;;  %v100_v12 = vld [vmem:[%s344_s2 + $0x78] sm:$0xff] }
   0x5   :  { %172 = vmatmul.msk.f32.vlgmr.msra.gmra.mxu0 %vm18_vm1, %v14_v2  ;;  %78 = vmatpush.msra.mxu1 %v59_v4  ;;  %v101_v11 = vld [vmem:[%s344_s2 + $0x80] sm:$0xff]  ;;  %v99_v13 = vld [vmem:[%s344_s2 + $0x70] sm:$0xff]  ;;  %v98_v14 = vld [vmem:[%s344_s2 + $0x68] sm:$0xff] }
   0x6   :  { %107 = vmatpush.msra.mxu2 %v102_v10  ;;  %v97_v15 = vld [vmem:[%s344_s2 + $0x60] sm:$0xff]  ;;  %v96_v16 = vld [vmem:[%s344_s2 + $0x58] sm:$0xff]  ;;  %v95_v17 = vld [vmem:[%s344_s2 + $0x50] sm:$0xff] }
   0x7   :  { %79 = vmatpush.msra.mxu1 %v58_v5  ;;  %v17_v18 = vld [vmem:[%s344_s2 + $0x10] sm:$0x1]  ;;  %v94_v19 = vld [vmem:[%s344_s2 + $0x48] sm:$0xff]  ;;  %v93_v20 = vld [vmem:[%s344_s2 + $0x40] sm:$0xff] }
   0x8   :  { %108 = vmatpush.msra.mxu2 %v101_v11  ;;  %vm46_vm2 = vcmp.ge.f32.partialorder %v17_v18, 0.0  ;;  %v92_v21 = vld [vmem:[%s344_s2 + $0x38] sm:$0xff]  ;;  %v91_v24 = vld [vmem:[%s344_s2 + $0x30] sm:$0xff]  ;;  %v90_v31 = vld [vmem:[%s344_s2 + $0x28] sm:$0xff] }
   0x9   :  { %80 = vmatpush.msra.mxu1 %v57_v6  ;;  %v51_v23 = vsel %vm46_vm2, 1, %v181_v22  ;;  %v177_v26 = vld [vmem:[%s344_s2 + $0x10] ss:$0 sm:$0xff]  ;;  %v89_v32 = vld [vmem:[%s344_s2 + $0x20] sm:$0xff]  ;;  %v88_v33 = vld [vmem:[%s344_s2 + $0x18] sm:$0xff] }
   0xa   :  { %109 = vmatpush.msra.mxu2 %v100_v12  ;;  %v52_v25 = vperm.slane %v51_v23, 0  ;;  %v142_v34 = vld [vmem:[%s344_s2 + $0x110] sm:$0xff]  ;;  %v141_v35 = vld [vmem:[%s344_s2 + $0x108] sm:$0xff]  ;;  %v140_v36 = vld [vmem:[%s344_s2 + $0x100] sm:$0xff] }
   0xb   :  { %81 = vmatpush.msra.mxu1 %v56_v7  ;;  %145 = vmatpush.msra.mxu3 %v142_v34  ;;  %v139_v37 = vld [vmem:[%s344_s2 + $0xf8] sm:$0xff]  ;;  %v138_v38 = vld [vmem:[%s344_s2 + $0xf0] sm:$0xff]  ;;  %v137_v39 = vld [vmem:[%s344_s2 + $0xe8] sm:$0xff] }
   0xc   :  { %110 = vmatpush.msra.mxu2 %v99_v13  ;;  %vm53_vm3 = vcmp.eq.s32.totalorder %v52_v25, 1  ;;  %v136_v40 = vld [vmem:[%s344_s2 + $0xe0] sm:$0xff]  ;;  %v135_v41 = vld [vmem:[%s344_s2 + $0xd8] sm:$0xff]  ;;  %v134_v42 = vld [vmem:[%s344_s2 + $0xd0] sm:$0xff] }
   0xd   :  { %82 = vmatpush.msra.mxu1 %v55_v8  ;;  %146 = vmatpush.msra.mxu3 %v141_v35  ;;  %v133_v43 = vld [vmem:[%s344_s2 + $0xc8] sm:$0xff]  ;;  %v132_v44 = vld [vmem:[%s344_s2 + $0xc0] sm:$0xff]  ;;  %v131_v45 = vld [vmem:[%s344_s2 + $0xb8] sm:$0xff] }
   0xe   :  { %111 = vmatpush.msra.mxu2 %v98_v14  ;;  %v130_v46 = vld [vmem:[%s344_s2 + $0xb0] sm:$0xff]  ;;  %v129_v51 = vld [vmem:[%s344_s2 + $0xa8] sm:$0xff]  ;;  %v128_v52 = vld [vmem:[%s344_s2 + $0xa0] sm:$0xff] }
   0xf   :  { %147 = vmatpush.msra.mxu3 %v140_v36  ;;  %v178_v47 = vld [vmem:[%s346_s1 + $0x30] ss:$0 sm:$0xff]  ;;  %v127_v53 = vld [vmem:[%s344_s2 + $0x98] sm:$0xff] }
  0x10   :  { %112 = vmatpush.msra.mxu2 %v97_v15  ;;  %v179_v54 = vld [vmem:[%s344_s2 + $0x118] ss:$0 sm:$0xff]  ;;  %v180_v58 = vld [vmem:[%s344_s2 + $0x119] ss:$0 sm:$0xff] }
  0x11   :  { %148 = vmatpush.msra.mxu3 %v139_v37 }
  0x12   :  { %113 = vmatpush.msra.mxu2 %v96_v16 }
  0x13   :  { %149 = vmatpush.msra.mxu3 %v138_v38 }
  0x14   :  { %114 = vmatpush.msra.mxu2 %v95_v17 }
  0x15   :  { %150 = vmatpush.msra.mxu3 %v137_v39 }
  0x16   :  { %115 = vmatpush.msra.mxu2 %v94_v19 }
  0x17   :  { %151 = vmatpush.msra.mxu3 %v136_v40 }
  0x18   :  { %116 = vmatpush.msra.mxu2 %v93_v20 }
  0x19   :  { %152 = vmatpush.msra.mxu3 %v135_v41 }
  0x1a   :  { %117 = vmatpush.msra.mxu2 %v92_v21 }
  0x1b   :  { %153 = vmatpush.msra.mxu3 %v134_v42 }
  0x1c   :  { %118 = vmatpush.msra.mxu2 %v91_v24 }
  0x1d   :  { %154 = vmatpush.msra.mxu3 %v133_v43 }
  0x1e   :  { %119 = vmatpush.msra.mxu2 %v90_v31 }
  0x1f   :  { %155 = vmatpush.msra.mxu3 %v132_v44 }
  0x20   :  { %120 = vmatpush.msra.mxu2 %v89_v32 }
  0x21   :  { %156 = vmatpush.msra.mxu3 %v131_v45 }
  0x22   :  { %121 = vmatpush.msra.mxu2 %v88_v33 }
  0x23   :  { %157 = vmatpush.msra.mxu3 %v130_v46 }
  0x25   :  { %158 = vmatpush.msra.mxu3 %v129_v51 }
  0x27   :  { %159 = vmatpush.msra.mxu3 %v128_v52 }
  0x29   :  { %160 = vmatpush.msra.mxu3 %v127_v53 }
  0x82   :  { %v43_v27 = vpop.f32.mrf.mxu0 }
  0x83   :  { %vm48_vm4 = vcmp.eq.f32.partialorder %v43_v27, %v177_v26 }
  0x84   :  { %v173_v29 = vsel %vm48_vm4, 1.0, %v182_v28 }
  0x85   :  { %v54_v30 = vsel %vm53_vm3, %v173_v29, %v43_v27 }
  0x86   :  { %174 = vmatmul.msk.f32.vlgmr.msra.gmra.mxu1 %vm63_vm5, %v54_v30 }
 0x103   :  { %v84_v48 = vpop.f32.mrf.mxu1 }
 0x104   :  { %v85_v49 = vadd.f32 %v178_v47, %v84_v48 }
 0x106   :  { %v87_v50 = vmax.f32 %v85_v49, 0.0 }
 0x108   :  { %122 = vmatmul.f32.vlgmr.msra.gmra.mxu2 %v87_v50 }
 0x18b   :  { %v123_v55 = vpop.f32.mrf.mxu2 }
 0x18c   :  { %v124_v56 = vadd.f32 %v179_v54, %v123_v55 }
 0x18e   :  { %v126_v57 = vmax.f32 %v124_v56, 0.0 }
 0x190   :  { %161 = vmatmul.f32.vlgmr.msra.gmra.mxu3 %v126_v57 }
 0x213   :  { %v162_v59 = vpop.f32.mrf.mxu3 }
 0x214   :  { %v163_v60 = vadd.f32 %v180_v58, %v162_v59 }
 0x216   :  { %166 = vst.msk [vmem:[%s347_s3] sm:$0xff] %vm165_vm6, %v163_v60 }

</bundles_post_ra>
